<compile_context>
chip_gen: v6e
topology: v6e:2x2x1
jax: 0.10.0
libtpu: 0.0.40
codegen_flags: <defaults>
</compile_context>

<pallas_src>
import math
import functools

import jax
import jax.numpy as jnp
from jax.experimental import pallas as pl
from jax.experimental.pallas import tpu as pltpu


# ----------------------------- parameter setup -----------------------------
def make_positional_encoding_table(block_size: int, n_embd: int,
                                   dtype=jnp.float32) -> jax.Array:
    """Deterministic sinusoidal table, identical math to the PyTorch __init__."""
    position = jnp.arange(block_size, dtype=jnp.float32)[:, None]          # (S, 1)
    div_term = jnp.exp(jnp.arange(0, n_embd, 2, dtype=jnp.float32)
                       * (-math.log(10000.0) / n_embd))                    # (E/2,)
    angles = position * div_term                                           # (S, E/2)
    pe = jnp.zeros((block_size, n_embd), dtype=jnp.float32)
    pe = pe.at[:, 0::2].set(jnp.sin(angles))
    pe = pe.at[:, 1::2].set(jnp.cos(angles))
    return pe[None].astype(dtype)                                          # (1, S, E)


# ------------------------------ tile selection ------------------------------
_LANE = 128
_SUBLANE = 8
# ~2 MiB per x-block: double-buffered x/out (+ uniforms in training) stays
# well under the 16 MiB scoped-VMEM default of v5e, and is large enough to
# amortize the ~0.35 us per-grid-step overhead.
_BLOCK_BYTES_CAP = 2 * 1024 * 1024
_LANE_TILE_CAP = 4096


def _choose_tiles(B: int, N: int, itemsize: int):
    """Pick (batch_tile, lane_tile) obeying the (8,128)/full-dim rule."""
    # Lane tile: largest multiple-of-128 divisor of N (capped), else full N.
    tn = N
    if N % _LANE == 0:
        cap = min(N, _LANE_TILE_CAP)
        for t in range(cap - cap % _LANE, 0, -_LANE):
            if N % t == 0:
                tn = t
                break
    # Batch tile: full B, or a multiple-of-8 divisor of B, within the byte cap.
    budget_rows = max(1, _BLOCK_BYTES_CAP // (tn * itemsize))
    candidates = [B] + [d for d in range(_SUBLANE, B + 1, _SUBLANE) if B % d == 0]
    fitting = [d for d in candidates if d <= budget_rows]
    tb = max(fitting) if fitting else min(candidates)
    return tb, tn


# -------------------------------- kernels ----------------------------------
def _pe_add_kernel(x_ref, pe_ref, o_ref):
    # eval-mode: x + pe (dropout is identity); pe broadcasts over the batch rows
    o_ref[...] = (x_ref[...] + pe_ref[...]).astype(o_ref.dtype)


def _pe_add_dropout_kernel(x_ref, pe_ref, u_ref, o_ref, *, p: float):
    # training-mode: inverted dropout on (x + pe); uniforms are streamed in
    y = (x_ref[...] + pe_ref[...]).astype(jnp.float32)
    keep = u_ref[...] >= jnp.float32(p)
    scale = jnp.float32(1.0 / (1.0 - p))
    o_ref[...] = jnp.where(keep, y * scale, jnp.zeros_like(y)).astype(o_ref.dtype)


# -------------------------------- wrapper -----------------------------------
def positional_encoding(x: jax.Array, pe: jax.Array, *,
                        dropout_p: float = 0.1,
                        training: bool = False,
                        rng_key: jax.Array | None = None) -> jax.Array:
    """x: (B, S, E); pe: (1, S, E). Returns dropout(x + pe[:B])."""
    B, S, E = x.shape
    assert pe.shape == (1, S, E), "broadcast add requires seq == block_size"

    N = S * E
    x2 = x.reshape(B, N)                              # lane-dense layout
    pe2 = pe.reshape(1, N).astype(x.dtype)
    tb, tn = _choose_tiles(B, N, x.dtype.itemsize)
    grid = (N // tn, B // tb)                         # lane-tile outer, batch inner

    x_spec = pl.BlockSpec((tb, tn), lambda n, b: (b, n))
    pe_spec = pl.BlockSpec((1, tn), lambda n, b: (0, n))   # constant over inner b loop
    out_spec = pl.BlockSpec((tb, tn), lambda n, b: (b, n))
    cparams = pltpu.CompilerParams(dimension_semantics=("parallel", "parallel"))

    if (not training) or dropout_p <= 0.0:
        out2 = pl.pallas_call(
            _pe_add_kernel,
            out_shape=jax.ShapeDtypeStruct((B, N), x.dtype),
            grid_spec=pltpu.PrefetchScalarGridSpec(
                num_scalar_prefetch=0,
                grid=grid,
                in_specs=[x_spec, pe_spec],
                out_specs=out_spec,
            ),
            compiler_params=cparams,
        )(x2, pe2)
        return out2.reshape(B, S, E)

    if dropout_p >= 1.0:
        return jnp.zeros_like(x)

    if rng_key is None:
        rng_key = jax.random.PRNGKey(0)
    u = jax.random.uniform(rng_key, (B, N), dtype=jnp.float32)
    u_spec = pl.BlockSpec((tb, tn), lambda n, b: (b, n))

    kernel = functools.partial(_pe_add_dropout_kernel, p=float(dropout_p))
    out2 = pl.pallas_call(
        kernel,
        out_shape=jax.ShapeDtypeStruct((B, N), x.dtype),
        grid_spec=pltpu.PrefetchScalarGridSpec(
            num_scalar_prefetch=0,
            grid=grid,
            in_specs=[x_spec, pe_spec, u_spec],
            out_specs=out_spec,
        ),
        compiler_params=cparams,
    )(x2, pe2, u)
    return out2.reshape(B, S, E)


# ---------------------------------- main ------------------------------------
if __name__ == "__main__":
    B, S, E = 2, 8, 32          # batch, seq (== block_size), n_embd
    key = jax.random.PRNGKey(0)
    kx, kd = jax.random.split(key)
    x = jax.random.normal(kx, (B, S, E), dtype=jnp.float32)
    pe = make_positional_encoding_table(block_size=S, n_embd=E)

    # eval-mode forward (dropout == identity), check against plain-JAX reference
    y = positional_encoding(x, pe, dropout_p=0.1, training=False)
    y = jax.block_until_ready(y)
    ref = x + pe
    assert y.shape == x.shape and y.dtype == x.dtype
    assert jnp.allclose(y, ref, atol=1e-6), "mismatch vs reference add"

    # training-mode forward: every element is either 0 (dropped) or the
    # reference value scaled by 1/(1-p) (kept).
    p = 0.1
    y_train = positional_encoding(x, pe, dropout_p=p, training=True, rng_key=kd)
    y_train = jax.block_until_ready(y_train)
    assert y_train.shape == x.shape and y_train.dtype == x.dtype
    scaled = ref / (1.0 - p)
    ok = jnp.isclose(y_train, scaled, atol=1e-5) | (y_train == 0.0)
    assert bool(jnp.all(ok)), "dropout output not in {0, (x+pe)/(1-p)}"

    print("KERNEL_OK")
</pallas_src>

<mosaic_0001>
module attributes {stable_mosaic.version = 11 : i64} {
  func.func @_pe_add_kernel(%arg0: i32, %arg1: i32, %arg2: memref<2x256xf32, #tpu.memory_space<vmem>>, %arg3: memref<1x256xf32, #tpu.memory_space<vmem>>, %arg4: memref<2x256xf32, #tpu.memory_space<vmem>>) attributes {dimension_semantics = [#tpu.dimension_semantics<parallel>, #tpu.dimension_semantics<parallel>], iteration_bounds = array<i64: 1, 1>, scalar_prefetch = 0 : i64, scratch_operands = 0 : i64, tpu.core_type = #tpu.core_type<tc>, window_params = [{transform_indices = @transform_0, window_bounds = array<i64: 2, 256>}, {transform_indices = @transform_1, window_bounds = array<i64: 1, 256>}, {transform_indices = @transform_2, window_bounds = array<i64: 2, 256>}]} {
    %c0 = arith.constant 0 : index
    %c0_0 = arith.constant 0 : index
    %0 = vector.load %arg2[%c0, %c0_0] : memref<2x256xf32, #tpu.memory_space<vmem>>, vector<2x256xf32>
    %c0_1 = arith.constant 0 : index
    %c0_2 = arith.constant 0 : index
    %1 = vector.load %arg3[%c0_1, %c0_2] : memref<1x256xf32, #tpu.memory_space<vmem>>, vector<1x256xf32>
    %2 = vector.broadcast %1 : vector<1x256xf32> to vector<2x256xf32>
    %3 = arith.addf %0, %2 : vector<2x256xf32>
    %c0_3 = arith.constant 0 : index
    %c0_4 = arith.constant 0 : index
    %4 = vector.load %arg4[%c0_3, %c0_4] : memref<2x256xf32, #tpu.memory_space<vmem>>, vector<2x256xf32>
    tpu.vector_store %arg4[%c0_3, %c0_4], %3 {strides = array<i32>} : memref<2x256xf32, #tpu.memory_space<vmem>>, vector<2x256xf32>,
    return
  }
  func.func @transform_0(%arg0: i32, %arg1: i32) -> (i32, i32) {
    %c0_i32 = arith.constant 0 : i32
    return %arg1, %arg0 : i32, i32
  }
  func.func @transform_1(%arg0: i32, %arg1: i32) -> (i32, i32) {
    %c0_i32 = arith.constant 0 : i32
    %c0_i32_0 = arith.constant 0 : i32
    return %c0_i32, %arg0 : i32, i32
  }
  func.func @transform_2(%arg0: i32, %arg1: i32) -> (i32, i32) {
    %c0_i32 = arith.constant 0 : i32
    return %arg1, %arg0 : i32, i32
  }
}

</mosaic_0001>

<bundles_post_ra>
// kernel: tpu_custom_call.1
= control target key start
LH: loop header
LB: loop body
LE: loop exit
PB: predicated region body
PF: predicated region fallthrough
CT: control target
= control target key end

     0   :  { %7 = vsyncpa [#allocation3], 0  ;;  %s172_s0 = inlined_call_operand.hbm [shape: f32[2,256], index: 0, kind: input, shape index: {}]   ;;  %s173_s1 = inlined_call_operand.hbm [shape: f32[1,256], index: 1, kind: input, shape index: {}]   ;;  %s174_s2 = inlined_call_operand.hbm [shape: f32[2,256], index: 2, kind: output, shape index: {}]  }
   0x1   :  { %8 = vsyncpa [#allocation6], 0 }
   0x2   :  { %9 = vsyncpa [#allocation4], 0  ;;  %s144_s9 = smov [#allocation2]   ;;  %s145_s11 = smov [#allocation5]  }
   0x3   :  { %s16_s10 = sshll.u32 %s144_s9, 4  ;;  %s26_s12 = sshll.u32 %s145_s11, 4  ;;  %s17_s10 = int_to_ptr.vmem [resolvable:$true] %s16_s10  ;;  %s27_s12 = int_to_ptr.vmem [resolvable:$true] %s26_s12 }
   0x4   :  { %s86_s13 = scalar_lea.vmem %s17_s10, 64  ;;  %p91_p1 = scmp.lt.s32.totalorder %s17_s10, %s17_s10 }
   0x5   :  { %p87_p0 = scmp.ne.s32.totalorder %s17_s10, %s86_s13  ;;  %p92_p2 = scmp.lt.s32.totalorder %s86_s13, %s86_s13 }
   0x7   :  { %p93_p3 = por %p92_p2, %p91_p1 }
   0x9   :  { %p94_p4 = pnand %p93_p3, %p87_p0 }
   0xb   :  { %97 = shalt.err (!%p94_p4)
}
   0xc   :  { %19 = dma.hbm_to_vmem [thread:$0]  %s172_s0, 64, %s17_s10, [#allocation3]  }
   0xd   :  { %s106_s16 = scalar_lea.vmem %s27_s12, 32  ;;  %p111_p6 = scmp.lt.s32.totalorder %s27_s12, %s27_s12 }
   0xe   :  { %p107_p5 = scmp.ne.s32.totalorder %s27_s12, %s106_s16  ;;  %p112_p7 = scmp.lt.s32.totalorder %s106_s16, %s106_s16 }
  0x10   :  { %p113_p8 = por %p112_p7, %p111_p6 }
  0x12   :  { %p114_p9 = pnand %p113_p8, %p107_p5 }
  0x14   :  { %117 = shalt.err (!%p114_p9)
}
  0x15   :  { %29 = dma.hbm_to_vmem [thread:$0]  %s173_s1, 32, %s27_s12, [#allocation6]  }
  0x16   :  { %138 = dma.done.wait [#allocation3], 64  }
  0x17   :  { %139 = vsyncadd [#allocation3], 4294967232 }
  0x18   :  { %140 = dma.done.wait [#allocation6], 32  }
  0x19   :  { %141 = vsyncadd [#allocation6], 4294967264  ;;  %v39_v0 = vlaneseq  ;;  %v146_v1 = vmov 1983009808   ;;  %v37_v7 = vld [vmem:[#allocation5] sm:$0x3] }
  0x1a   :  { %v49_v2 = vunpack.c.l.s4 %v146_v1  ;;  %v36_v12 = vld [vmem:[#allocation2] sm:$0xf]  ;;  %s147_s0 = smov [#allocation7]  }
  0x1b   :  { %v40_v3 = vshrl.u32 %v39_v0, 7  ;;  %s64_s19 = sshll.u32 %s147_s0, 4  ;;  %s65_s19 = int_to_ptr.vmem [resolvable:$true] %s64_s19 }
  0x1c   :  { %v50_v6 = vunpack.c.0.s8 %v49_v2  ;;  %s118_s1 = scalar_lea.vmem %s65_s19, 64  ;;  %p123_p11 = scmp.lt.s32.totalorder %s65_s19, %s65_s19 }
  0x1d   :  { %v41_v4 = vsub.s32 0, %v40_v3  ;;  %v45_v5 = vsub.s32 1, %v40_v3  ;;  %p119_p10 = scmp.ne.s32.totalorder %s65_s19, %s118_s1  ;;  %p124_p12 = scmp.lt.s32.totalorder %s118_s1, %s118_s1 }
  0x1e   :  { %v53_v10 = vsub.s32 %v50_v6, %v40_v3 }
  0x1f   :  { %v42_v8 = vrot.slane %v37_v7, %v41_v4  ;;  %v46_v9 = vrot.slane %v37_v7, %v45_v5  ;;  %p125_p13 = por %p124_p12, %p123_p11 }
  0x21   :  { %v47_v11 = vcombine.low %v42_v8, %v46_v9  ;;  %p126_p0 = pnand %p125_p13, %p119_p10 }
  0x23   :  { %v54_v13 = vrot.slane %v47_v11, %v53_v10 }
  0x25   :  { %v56_v14 = vadd.f32 %v54_v13, %v36_v12 }
  0x27   :  { %57 = vst [vmem:[#allocation7] sm:$0xf] %v56_v14 }
  0x28   :  { %129 = shalt.err (!%p126_p0)
}
  0x29   :  { %67 = dma.vmem_to_hbm [thread:$0]  %s65_s19, 64, %s174_s2, [#allocation4]  }
  0x2a   :  { %142 = dma.done.wait [#allocation4], 64  }
  0x2b   :  { %143 = vsyncadd [#allocation4], 4294967232 }
  0x2c   :  { %71 = vsyncpa [#allocation3], 1 }
  0x2d   :  { %72 = vsyncpa [#allocation6], 1 }
  0x2e   :  { %73 = vsyncpa [#allocation4], 1 }

</bundles_post_ra>
